<compile_context>
chip_gen: v5e
topology: v5e:2x2
jax: 0.10.0
libtpu: 0.0.40
codegen_flags: <defaults>
</compile_context>

<pallas_src>
import math
from functools import partial

import jax
import jax.numpy as jnp
from jax import lax
from jax.experimental import pallas as pl
from jax.experimental.pallas import tpu as pltpu

_LANE = 128
_SUBLANE = 8


def _pad(n: int, m: int) -> int:
    return ((n + m - 1) // m) * m


def _vmem_capacity_bytes() -> int:
    try:
        cap = int(pltpu.get_tpu_info().vmem_capacity_bytes)
        if cap > 0:
            return cap
    except Exception:
        pass
    return 64 * 1024 * 1024  # conservative fallback: v7x per-core VMEM


def _pick_row_tile(n_rows, w, sh, sw, itemsize, budget_bytes, fixed_bytes):
    """Rows per block: as large as the VMEM budget allows (counting double buffering,
    lane padding and f32 intermediates), capped so the grid has at least 4 steps
    (>= 2 per TensorCore on v7x), sublane (8) aligned."""
    wo = w * sw
    in_row = _pad(w, _LANE) * itemsize
    out_row = _pad(sh * wo, _LANE) * itemsize
    per_row = (2 * (in_row + out_row)            # double-buffered in/out blocks
               + 4 * _pad(wo, _LANE)             # f32 `wide` intermediate
               + out_row                         # concatenated result before the store
               + 10 * _pad(w, _LANE))            # f32-split parts (hi/mid/lo + residual)
    avail = max(budget_bytes - fixed_bytes, 2 * 1024 * 1024)
    tr = max(1, avail // per_row)
    tr = min(tr, max(1, math.ceil(n_rows / 4)))  # keep >= 4 grid steps when possible
    if tr >= n_rows:
        return n_rows
    tr = max(_SUBLANE, (tr // _SUBLANE) * _SUBLANE)
    return min(tr, n_rows)


def _upsample_rows_kernel(x_ref, o_ref, *, sh, sw):
    # x_ref: (TR, W)        rows of the (N*C*H, W) input view
    # o_ref: (TR, sh*W*sw)  rows of the (N*C*H, sh*Wo) output view
    x = x_ref[...]
    w = x.shape[-1]
    wo = w * sw

    if sw == 1:
        wide = x.astype(o_ref.dtype)
    else:
        # 0/1 column-replication matrix, built on-chip (cheap VPU filler under the DMAs):
        #   crep[k, c] = 1  iff  c // sw == k   (written without integer division).
        k_idx = lax.broadcasted_iota(jnp.int32, (w, wo), 0)
        c_idx = lax.broadcasted_iota(jnp.int32, (w, wo), 1)
        crep = ((c_idx >= k_idx * sw) & (c_idx < (k_idx + 1) * sw)).astype(jnp.bfloat16)

        if x.dtype == jnp.bfloat16:
            # bf16 values pass through a 0/1 bf16 matmul with f32 accumulation exactly.
            wide = jnp.dot(x, crep, preferred_element_type=jnp.float32)
        else:
            # Exact float32 (and float16) path: split into three non-overlapping bf16
            # parts (hi + mid + lo == x exactly), push each through the bf16 MXU
            # (value * 1.0 is exact) and re-sum in f32 — bit-exact by construction,
            # independent of the backend's f32 matmul emulation mode.
            # TODO(synk): +/-inf inputs turn into NaN on this split path.
            xf = x.astype(jnp.float32)
            hi = xf.astype(jnp.bfloat16)
            r1 = xf - hi.astype(jnp.float32)
            mid = r1.astype(jnp.bfloat16)
            lo = (r1 - mid.astype(jnp.float32)).astype(jnp.bfloat16)
            wide = jnp.dot(hi, crep, preferred_element_type=jnp.float32)
            wide = wide + jnp.dot(mid, crep, preferred_element_type=jnp.float32)
            wide = wide + jnp.dot(lo, crep, preferred_element_type=jnp.float32)
        wide = wide.astype(o_ref.dtype)

    if sh == 1:
        o_ref[...] = wide
    else:
        # Row repeat: in the (rows, sh, Wo) view of the output each of the sh copies is
        # a lane-contiguous slab -> plain lane concatenation, no second matmul.
        o_ref[...] = jnp.concatenate([wide] * sh, axis=-1)


def upsample_nearest(x, scale_factor=2):
    """Nearest-neighbour upsampling of an NCHW tensor by integer scale factor(s)."""
    assert x.ndim == 4, "expected NCHW input"
    if isinstance(scale_factor, (tuple, list)):
        sh, sw = int(scale_factor[0]), int(scale_factor[1])
    else:
        sh = sw = int(scale_factor)
    assert sh >= 1 and sw >= 1, "integer scale factors >= 1 only"

    n, c, h, w = x.shape
    ho, wo = h * sh, w * sw

    # Fixed in-kernel workspace for the replication matrix + iota intermediates.
    crep_workspace = _pad(w, _SUBLANE) * _pad(wo, _LANE) * 8 if sw > 1 else 0

    supported_dtype = x.dtype.name in ("float32", "bfloat16", "float16")
    if not supported_dtype or crep_workspace > 20 * 1024 * 1024:
        # TODO(synk): integer/bool/f64 dtypes and very wide rows (W >~ 1-2K) fall back
        # to plain-JAX nearest repeat instead of the MXU replication formulation.
        return jnp.repeat(jnp.repeat(x, sh, axis=2), sw, axis=3)

    rows = n * c * h
    x2 = x.reshape(rows, w)                          # contiguous merge -> free reshape

    itemsize = jnp.dtype(x.dtype).itemsize
    capacity = _vmem_capacity_bytes()
    budget = min(max(capacity // 3, 16 * 1024 * 1024), 40 * 1024 * 1024)
    tr = _pick_row_tile(rows, w, sh, sw, itemsize, budget, crep_workspace)
    grid = (pl.cdiv(rows, tr),)

    vmem_limit = int(min(capacity - 8 * 1024 * 1024,
                         max(48 * 1024 * 1024, 2 * budget + crep_workspace)))

    out2 = pl.pallas_call(
        partial(_upsample_rows_kernel, sh=sh, sw=sw),
        out_shape=jax.ShapeDtypeStruct((rows, sh * wo), x.dtype),
        grid=grid,
        in_specs=[pl.BlockSpec((tr, w), lambda i: (i, 0))],
        out_specs=pl.BlockSpec((tr, sh * wo), lambda i: (i, 0)),
        compiler_params=pltpu.CompilerParams(
            dimension_semantics=("parallel",),       # independent rows; v7x TCs split them
            vmem_limit_bytes=vmem_limit,
        ),
    )(x2)

    # (rows, sh*Wo) is exactly (N, C, H, sh, Wo) in memory -> free reshape to NCHW.
    return out2.reshape(n, c, ho, wo)


class UpSample:
    """Mirror of the PyTorch UpSample module (nearest-neighbour only)."""

    def __init__(self, scale_factor=2, mode="nearest"):
        if mode != "nearest":
            # TODO(synk): bilinear/bicubic interpolation (align_corners) not implemented.
            raise NotImplementedError(f"mode={mode!r} not supported (nearest only)")
        self.scale_factor = scale_factor
        self.mode = mode

    def __call__(self, x):
        assert x.ndim == 4
        # PyTorch rejects align_corners for 'nearest'; it has no effect here.
        return upsample_nearest(x, self.scale_factor)


if __name__ == "__main__":
    key = jax.random.PRNGKey(0)
    x = jax.random.normal(key, (2, 4, 16, 16), dtype=jnp.float32)

    layer = UpSample(scale_factor=2, mode="nearest")
    y = layer(x)
    jax.block_until_ready(y)

    expected = jnp.repeat(jnp.repeat(x, 2, axis=2), 2, axis=3)
    assert y.shape == (2, 4, 32, 32), y.shape
    assert y.dtype == x.dtype, (y.dtype, x.dtype)
    assert bool(jnp.all(y == expected)), "float32 nearest-upsample mismatch"

    # bf16 exercises the native bf16 MXU path; also bit-exact.
    xb = x.astype(jnp.bfloat16)
    yb = layer(xb)
    jax.block_until_ready(yb)
    expected_b = jnp.repeat(jnp.repeat(xb, 2, axis=2), 2, axis=3)
    assert yb.dtype == jnp.bfloat16, yb.dtype
    assert bool(jnp.all(yb == expected_b)), "bfloat16 nearest-upsample mismatch"

    print("KERNEL_OK")
</pallas_src>

<mosaic_0001>
module attributes {stable_mosaic.version = 11 : i64} {
  func.func @_upsample_rows_kernel(%arg0: i32, %arg1: memref<32x16xf32, #tpu.memory_space<vmem>>, %arg2: memref<32x64xf32, #tpu.memory_space<vmem>>) attributes {dimension_semantics = [#tpu.dimension_semantics<parallel>], iteration_bounds = array<i64: 4>, scalar_prefetch = 0 : i64, scratch_operands = 0 : i64, tpu.core_type = #tpu.core_type<tc>, window_params = [{transform_indices = @transform_0, window_bounds = array<i64: 32, 16>}, {transform_indices = @transform_1, window_bounds = array<i64: 32, 64>}]} {
    %c0 = arith.constant 0 : index
    %c0_0 = arith.constant 0 : index
    %0 = vector.load %arg1[%c0, %c0_0] : memref<32x16xf32, #tpu.memory_space<vmem>>, vector<32x16xf32>
    %1 = tpu.iota {dimensions = array<i32: 0>} : vector<16x32xi32>
    %2 = tpu.iota {dimensions = array<i32: 1>} : vector<16x32xi32>
    %c2_i32 = arith.constant 2 : i32
    %3 = vector.broadcast %c2_i32 : i32 to vector<16x32xi32>
    %4 = arith.muli %1, %3 : vector<16x32xi32>
    %5 = arith.cmpi sge, %2, %4 : vector<16x32xi32>
    %c1_i32 = arith.constant 1 : i32
    %6 = vector.broadcast %c1_i32 : i32 to vector<16x32xi32>
    %7 = arith.addi %1, %6 : vector<16x32xi32>
    %c2_i32_1 = arith.constant 2 : i32
    %8 = vector.broadcast %c2_i32_1 : i32 to vector<16x32xi32>
    %9 = arith.muli %7, %8 : vector<16x32xi32>
    %10 = arith.cmpi slt, %2, %9 : vector<16x32xi32>
    %11 = arith.andi %5, %10 : vector<16x32xi1>
    %12 = arith.extui %11 : vector<16x32xi1> to vector<16x32xi32>
    %13 = arith.sitofp %12 : vector<16x32xi32> to vector<16x32xf32>
    %14 = arith.truncf %13 : vector<16x32xf32> to vector<16x32xbf16>
    %15 = arith.truncf %0 : vector<32x16xf32> to vector<32x16xbf16>
    %16 = arith.extf %15 : vector<32x16xbf16> to vector<32x16xf32>
    %17 = arith.subf %0, %16 : vector<32x16xf32>
    %18 = arith.truncf %17 : vector<32x16xf32> to vector<32x16xbf16>
    %19 = arith.extf %18 : vector<32x16xbf16> to vector<32x16xf32>
    %20 = arith.subf %17, %19 : vector<32x16xf32>
    %21 = arith.truncf %20 : vector<32x16xf32> to vector<32x16xbf16>
    %cst = arith.constant dense<0.000000e+00> : vector<32x32xf32>
    %22 = tpu.matmul %15, %14, %cst {dimension_numbers = #tpu.dot_dimension_numbers<[1], [0], [0], [1], [0, 0, 1, 1], [], []>} : vector<32x16xbf16>, vector<16x32xbf16>, vector<32x32xf32> -> vector<32x32xf32>
    %cst_2 = arith.constant dense<0.000000e+00> : vector<32x32xf32>
    %23 = tpu.matmul %18, %14, %cst_2 {dimension_numbers = #tpu.dot_dimension_numbers<[1], [0], [0], [1], [0, 0, 1, 1], [], []>} : vector<32x16xbf16>, vector<16x32xbf16>, vector<32x32xf32> -> vector<32x32xf32>
    %24 = arith.addf %22, %23 : vector<32x32xf32>
    %cst_3 = arith.constant dense<0.000000e+00> : vector<32x32xf32>
    %25 = tpu.matmul %21, %14, %cst_3 {dimension_numbers = #tpu.dot_dimension_numbers<[1], [0], [0], [1], [0, 0, 1, 1], [], []>} : vector<32x16xbf16>, vector<16x32xbf16>, vector<32x32xf32> -> vector<32x32xf32>
    %26 = arith.addf %24, %25 : vector<32x32xf32>
    %27 = tpu.concatenate %26, %26 in 1 : vector<32x32xf32>, vector<32x32xf32> -> vector<32x64xf32>
    %c0_4 = arith.constant 0 : index
    %c0_5 = arith.constant 0 : index
    %28 = vector.load %arg2[%c0_4, %c0_5] : memref<32x64xf32, #tpu.memory_space<vmem>>, vector<32x64xf32>
    tpu.vector_store %arg2[%c0_4, %c0_5], %27 {strides = array<i32>} : memref<32x64xf32, #tpu.memory_space<vmem>>, vector<32x64xf32>,
    return
  }
  func.func @transform_0(%arg0: i32) -> (i32, i32) {
    %c0_i32 = arith.constant 0 : i32
    %c0_i32_0 = arith.constant 0 : i32
    return %arg0, %c0_i32 : i32, i32
  }
  func.func @transform_1(%arg0: i32) -> (i32, i32) {
    %c0_i32 = arith.constant 0 : i32
    %c0_i32_0 = arith.constant 0 : i32
    return %arg0, %c0_i32 : i32, i32
  }
}

</mosaic_0001>

<bundles_post_ra>
// kernel: tpu_custom_call.1
= control target key start
LH: loop header
LB: loop body
LE: loop exit
PB: predicated region body
PF: predicated region fallthrough
CT: control target
= control target key end

     0   :  { %s411_s6 = smov 0   ;;  %s459_s0 = inlined_call_operand.vmem [shape: f32[128,16], index: 0, kind: input, shape index: {}]   ;;  %s460_s1 = inlined_call_operand.vmem [shape: f32[128,64], index: 1, kind: output, shape index: {}]  }
   0x1 LB: > { %s355_s7 = sadd.s32 4294967295, %s397_s6   ;;  %p359_p0 = scmp.ge.s32.totalorder %s397_s6, 1  ;;  %s397_s6 = sphi %s411_s6, %s11_s6  }
   0x2   : > { %p88_p1 = scmp.lt.s32.totalorder %s397_s6, 5 }
   0x4   : > { %p89_p2 = pnand %p359_p0, %p88_p1 }
   0x5   : > { %s360_s8 = sshll.u32 (!%p89_p2), %s355_s7, 2  ;;  %s400_s13 = smov (!%p89_p2), 32  }
   0x6   : > { %92 = sbr.rel (%p89_p2) target bundleno = 306 (0x132), region = 24  ;;  %p109_p3 = scmp.lt.s32.totalorder (!%p89_p2), %s360_s8, 15 }
   0xb   : > { %v125_v0 = vlaneseq  ;;  %s468_s8 = smov (!%p109_p3, %s360_s8), 15  ;;  %v399_v28 = vmov 1.0|1.0   ;;  %vm183_vm7 = vcmask 130048   ;;  %vm289_vm8 = vcmask 261120  }
   0xc   : > { %s361_s9 = sshll.u32 %s468_s8, 3  ;;  %vm294_vm9 = vcmask 523264  }
   0xd   : > { %v126_v1 = vshrl.u32 %v125_v0, 7  ;;  %v129_v2 = vand.u32 127, %v125_v0  ;;  %s112_s12 = scalar_lea.vmem %s459_s0, %s361_s9  ;;  %s118_s16 = scalar_lea.vmem %s460_s1, %s361_s9 }
   0xe   : > { %v121_v10 = vld [vmem:[%s112_s12] sm:$0xff]  ;;  %v122_v11 = vld [vmem:[%s112_s12 + $0x8] sm:$0xff]  ;;  %v123_v12 = vld [vmem:[%s112_s12 + $0x10] sm:$0xff] }
   0xf   : > { %v127_v3 = vadd.s32 8, %v126_v1  ;;  %v130_v4 = vmul.u32 2, %v126_v1  ;;  %v134_v5 = vadd.s32 1, %v126_v1  ;;  %v147_v16 = vpack.c.bf16 %v121_v10, %v121_v10  ;;  %v124_v17 = vld [vmem:[%s112_s12 + $0x18] sm:$0xff] }
  0x10   : > { %v148_v18 = vpack.c.bf16 %v122_v11, %v122_v11  ;;  %v149_v19 = vpack.c.bf16 %v123_v12, %v123_v12  ;;  %v150_v20 = vpack.c.bf16 %v124_v17, %v124_v17 }
  0x11   : > { %v131_v6 = vmul.u32 2, %v127_v3  ;;  %vm422_vm0 = vcmp.ge.s32.totalorder %v129_v2, %v130_v4  ;;  %v135_v8 = vadd.s32 1, %v127_v3  ;;  %v136_v9 = vmul.u32 2, %v134_v5 }
  0x12   : > { %v151_v21 = vunpack.c.l.bf16 %v147_v16  ;;  %v213_v22 = vunpack.c.l.b16 %v147_v16  ;;  %v152_v23 = vunpack.c.l.bf16 %v148_v18  ;;  %v214_v24 = vunpack.c.l.b16 %v148_v18 }
  0x13   : > { %vm431_vm1 = vcmp.ge.s32.totalorder %v129_v2, %v131_v6  ;;  %v137_v14 = vmul.u32 2, %v135_v8  ;;  %vm435_vm2 = vcmp.lt.s32.totalorder %v129_v2, %v136_v9  ;;  %v153_v25 = vunpack.c.l.bf16 %v149_v19 }
  0x14   : > { %vm140_vm3 = vmand %vm422_vm0, %vm435_vm2  ;;  %v154_v26 = vunpack.c.l.bf16 %v150_v20  ;;  %v155_v27 = vsub.f32 %v121_v10, %v151_v21  ;;  %v217_v29 = vpack.c.b16 %v214_v24, %v213_v22  ;;  %v156_v30 = vsub.f32 %v122_v11, %v152_v23 }
  0x15   : > { %vm139_vm4 = vcmp.lt.s32.totalorder %v129_v2, %v137_v14  ;;  %v157_v31 = vsub.f32 %v123_v12, %v153_v25  ;;  %v215_v48 = vunpack.c.l.b16 %v149_v19  ;;  %v216_v49 = vunpack.c.l.b16 %v150_v20 }
  0x16   : > { %vm141_vm5 = vmand %vm431_vm1, %vm139_vm4  ;;  %v159_v32 = vpack.c.bf16 %v155_v27, %v155_v27  ;;  %v158_v33 = vsub.f32 %v124_v17, %v154_v26  ;;  %v160_v34 = vpack.c.bf16 %v156_v30, %v156_v30 }
  0x17   : > { %vm366_vm6 = vmpackc.low %vm141_vm5, %vm140_vm3  ;;  %v161_v35 = vpack.c.bf16 %v157_v31, %v157_v31  ;;  %v218_v52 = vpack.c.b16 %v216_v49, %v215_v48 }
  0x18   : > { %371 = vmatpush.bf16.msk.msra.mxu1 %vm366_vm6, %v399_v28  ;;  %367 = vmatpush.bf16.msk.msra.mxu0 %vm366_vm6, %v399_v28  ;;  %v177_v36 = vunpack.c.l.b16 %v159_v32  ;;  %v163_v37 = vunpack.c.l.bf16 %v159_v32  ;;  %v162_v38 = vpack.c.bf16 %v158_v33, %v158_v33  ;;  %v178_v39 = vunpack.c.l.b16 %v160_v34 }
  0x19   : > { %375 = vmatpush.bf16.msk.msra.mxu2 %vm366_vm6, %v399_v28  ;;  %380 = vmatpush.bf16.msk.msra.mxu3 %vm366_vm6, %v399_v28  ;;  %v164_v40 = vunpack.c.l.bf16 %v160_v34  ;;  %v179_v41 = vunpack.c.l.b16 %v161_v35  ;;  %v165_v50 = vunpack.c.l.bf16 %v161_v35 }
  0x1a   : > { %v167_v42 = vsub.f32 %v155_v27, %v163_v37  ;;  %v180_v43 = vunpack.c.l.b16 %v162_v38  ;;  %v181_v44 = vpack.c.b16 %v178_v39, %v177_v36  ;;  %v166_v51 = vunpack.c.l.bf16 %v162_v38 }
  0x1b   : > { %372 = vmatmul.msk.bf16.vlgmr.msra.gmra.mxu1 %vm183_vm7, %v217_v29  ;;  %v168_v45 = vsub.f32 %v156_v30, %v164_v40  ;;  %v169_v53 = vsub.f32 %v157_v31, %v165_v50 }
  0x1c   : > { %v182_v46 = vpack.c.b16 %v180_v43, %v179_v41  ;;  %368 = vmatmul.msk.bf16.vlgmr.msra.gmra.mxu0 %vm183_vm7, %v181_v44  ;;  %v170_v54 = vsub.f32 %v158_v33, %v166_v51 }
  0x1d   : > { %v171_v47 = vpack.c.bf16 %v168_v45, %v167_v42 }
  0x1e   : > { %369 = vmatmul.msk.bf16.vlgmr.msra.gmra.mxu3 %vm183_vm7, %v182_v46  ;;  %v172_v55 = vpack.c.bf16 %v170_v54, %v169_v53 }
  0x1f   : > { %376 = vmatmul.msk.bf16.vlgmr.msra.gmra.mxu2 %vm183_vm7, %v171_v47 }
  0x2b   : > { %373 = vmatmul.msk.bf16.gmra.mxu1 %vm183_vm7, %v218_v52 }
  0x2f   : > { %377 = vmatmul.msk.bf16.gmra.mxu2 %vm183_vm7, %v172_v55 }
  0x98   : > { %v234_v56 = vpop.f32.mrf.mxu1 }
  0x99   : > { %v199_v57 = vpop.f32.mrf.mxu0 }
  0x9a   : > { %v235_v58 = vadd.f32 %v234_v56, %v199_v57 }
  0xa0   : > { %v236_v59 = vpop.f32.mrf.mxu1 }
  0xa1   : > { %v201_v62 = vpop.f32.mrf.mxu0  ;;  %v204_v2 = vpop.f32.mrf.mxu3 }
  0xa2   : > { %v259_v60 = vpop.f32.mrf.mxu2  ;;  %v237_v63 = vadd.f32 %v236_v59, %v201_v62 }
  0xa3   : > { %v269_v61 = vadd.f32 %v259_v60, %v235_v58 }
  0xa5   : > { %277 = vrot.lane.b32.xlu0 %v269_v61, %s400_s13 }
  0xa8   : > { %v239_v3 = vpop.f32.mrf.mxu1 }
  0xa9   : > { %v240_v4 = vadd.f32 %v239_v3, %v204_v2  ;;  %v206_v7 = vpop.f32.mrf.mxu3 }
  0xaa   : > { %v261_v0 = vpop.f32.mrf.mxu2 }
  0xab   : > { %v270_v1 = vadd.f32 %v261_v0, %v237_v63 }
  0xad   : > { %279 = vrot.lane.b32.xlu0 %v270_v1, %s400_s13 }
  0xb0   : > { %v241_v8 = vpop.f32.mrf.mxu1 }
  0xb1   : > { %v242_v9 = vadd.f32 %v241_v8, %v206_v7 }
  0xb2   : > { %v264_v5 = vpop.f32.mrf.mxu2 }
  0xb3   : > { %v271_v6 = vadd.f32 %v264_v5, %v240_v4 }
  0xb5   : > { %281 = vrot.lane.b32.xlu1 %v271_v6, %s400_s13 }
  0xba   : > { %v266_v10 = vpop.f32.mrf.mxu2 }
  0xbb   : > { %v272_v11 = vadd.f32 %v266_v10, %v242_v9 }
  0xbd   : > { %283 = vrot.lane.b32.xlu1 %v272_v11, %s400_s13 }
 0x117   : > { %v278_v12 = vpop.permute.xlu0 %277 }
 0x118   : > { %v290_v13 = vsel %vm289_vm8, %v269_v61, %v278_v12 }
 0x119   : > { %295 = vst.msk [vmem:[%s118_s16] sm:$0xff] %vm294_vm9, %v290_v13 }
 0x11f   : > { %v280_v14 = vpop.permute.xlu0 %279 }
 0x120   : > { %v291_v15 = vsel %vm289_vm8, %v270_v1, %v280_v14 }
 0x121   : > { %296 = vst.msk [vmem:[%s118_s16 + $0x8] sm:$0xff] %vm294_vm9, %v291_v15 }
 0x127   : > { %v282_v16 = vpop.permute.xlu1 %281 }
 0x128   : > { %v292_v17 = vsel %vm289_vm8, %v271_v6, %v282_v16 }
 0x129   : > { %297 = vst.msk [vmem:[%s118_s16 + $0x10] sm:$0xff] %vm294_vm9, %v292_v17 }
 0x12f   : > { %v284_v18 = vpop.permute.xlu1 %283 }
 0x130   : > { %v293_v19 = vsel %vm289_vm8, %v272_v11, %v284_v18 }
 0x131   : > { %298 = vst.msk [vmem:[%s118_s16 + $0x18] sm:$0xff] %vm294_vm9, %v293_v19 }
 0x132 PF: > { %s11_s6 = sadd.s32 1, %s397_s6  }
 0x133   : > { %p8_p4 = scmp.ge.s32.totalorder %s11_s6, 6  }
 0x135   :  { %10 = sbr.rel (!%p8_p4) target bundleno = 1 (0x1), region = 54 }

</bundles_post_ra>
